<compile_context>
chip_gen: v5e
topology: v5e:2x2
jax: 0.10.0
libtpu: 0.0.40
codegen_flags: <defaults>
</compile_context>

<pallas_src>
import jax
import jax.numpy as jnp
from jax.experimental import pallas as pl
from jax.experimental.pallas import tpu as pltpu


def _round_up(x, m):
    return (x + m - 1) // m * m


def _patch_proj_kernel(x_ref, w_ref, b_ref, o_ref):
    # x_ref: (TM, K)  bf16 patch tile (tiled over M)
    # w_ref: (K, E)   bf16 weight, VMEM-resident across the whole grid
    # b_ref: (1, E)   f32 bias,    VMEM-resident
    # o_ref: (TM, E)  output tile (E == full last dim; no pad, no post-slice)
    acc = jnp.dot(x_ref[...], w_ref[...], preferred_element_type=jnp.float32)
    o_ref[...] = (acc + b_ref[...]).astype(o_ref.dtype)


def patch_embed_forward(x, weight, bias, patch_size, *, tm_rows=4096,
                        compute_dtype=jnp.bfloat16, out_dtype=None,
                        allow_input_fusion=False):
    """PatchEmbed.forward.

    x:      (B, C, H, W)   NCHW input
    weight: (E, C, ph, pw) conv weight
    bias:   (E,)           conv bias
    returns (B, Ho*Wo, E)  in out_dtype (default: x.dtype)
    """
    B, C, H, W = x.shape
    E = weight.shape[0]
    ph, pw = patch_size
    assert H % ph == 0 and W % pw == 0, "image size must be divisible by patch size"
    Ho, Wo = H // ph, W // pw
    num_patches = Ho * Wo
    K = C * ph * pw
    M = B * num_patches
    out_dtype = x.dtype if out_dtype is None else out_dtype

    # --- glue: extract non-overlapping patches as an (M, K) matrix.
    # Single XLA fusion; the bf16 cast is folded into the transpose so the
    # rearrangement is one HBM pass at half the f32 write width.  With
    # allow_input_fusion=True, XLA may fold this producer into the kernel's
    # input DMA and skip the intermediate entirely.
    xb = x.astype(compute_dtype)
    patches = (xb.reshape(B, C, Ho, ph, Wo, pw)
                 .transpose(0, 2, 4, 1, 3, 5)          # (B, Ho, Wo, C, ph, pw)
                 .reshape(M, K))

    # Conv weight (E, C, ph, pw) -> (K, E); feature order (c, i, j) matches patches.
    w_mat = weight.reshape(E, K).T.astype(compute_dtype)
    b_mat = bias.astype(jnp.float32).reshape(1, E)

    # M tile: split into >= 2 tiles whenever possible (feeds both v7x TCs via the
    # "parallel" axis); cap at tm_rows.  TM stays a multiple of 8 (sublane rule);
    # a ragged trailing block is masked by Pallas.
    TM = min(tm_rows, _round_up(pl.cdiv(M, 2), 8))
    if TM >= M:
        TM = M          # single full-extent block (always a legal block shape)
    grid_m = pl.cdiv(M, TM)

    # VMEM budget: double-buffered patch/output tiles + f32 accumulator +
    # weight/bias (default double-buffered even though resident), 2x headroom,
    # small floor for Mosaic internal temporaries, cap well under v7x's 64 MiB.
    in_bytes = jnp.dtype(compute_dtype).itemsize
    out_bytes = jnp.dtype(out_dtype).itemsize
    vmem_need = (2 * TM * K * in_bytes        # patch tiles (double-buffered)
                 + 2 * TM * E * out_bytes     # output tiles (double-buffered)
                 + TM * E * 4                 # f32 matmul accumulator
                 + 2 * K * E * in_bytes       # weight
                 + 2 * E * 4)                 # bias
    vmem_limit = int(min(max(2 * vmem_need, 4 * 1024 * 1024), 40 * 1024 * 1024))

    cost = pl.CostEstimate(
        flops=2 * M * K * E,
        transcendentals=0,
        bytes_accessed=(M * K * in_bytes + K * E * in_bytes + E * 4
                        + M * E * out_bytes),
    )

    cp_kwargs = dict(dimension_semantics=("parallel",),
                     vmem_limit_bytes=vmem_limit)
    if allow_input_fusion:
        # Fuse the patchify producer (reshape/transpose/cast) into input 0's DMA.
        cp_kwargs["allow_input_fusion"] = [True, False, False]

    out = pl.pallas_call(
        _patch_proj_kernel,
        out_shape=jax.ShapeDtypeStruct((M, E), out_dtype),
        grid_spec=pltpu.PrefetchScalarGridSpec(
            num_scalar_prefetch=0,
            grid=(grid_m,),
            in_specs=[
                pl.BlockSpec((TM, K), lambda i: (i, 0)),   # patches: tiled over M
                pl.BlockSpec((K, E), lambda i: (0, 0)),    # weight: resident
                pl.BlockSpec((1, E), lambda i: (0, 0)),    # bias:   resident
            ],
            out_specs=pl.BlockSpec((TM, E), lambda i: (i, 0)),
        ),
        compiler_params=pltpu.CompilerParams(**cp_kwargs),
        cost_estimate=cost,
    )(patches, w_mat, b_mat)

    # (B*Ho*Wo, E) -> (B, Ho*Wo, E)  == conv(x).flatten(2).transpose(1, 2)
    return out.reshape(B, num_patches, E)


if __name__ == "__main__":
    # Small shapes consistent with the module: img 16x16, patch 4, in_chans 4, embed 32.
    B, C, H, W = 2, 4, 16, 16
    patch_size = (4, 4)
    embed_dim = 32

    key = jax.random.PRNGKey(0)
    kx, kw, kb = jax.random.split(key, 3)
    x = jax.random.normal(kx, (B, C, H, W), dtype=jnp.float32)
    # Deterministic synthetic Conv2d proj parameters; proj_2 / norm unused in forward.
    weight = jax.random.normal(kw, (embed_dim, C, patch_size[0], patch_size[1]),
                               dtype=jnp.float32) * 0.05
    bias = jax.random.normal(kb, (embed_dim,), dtype=jnp.float32) * 0.01

    y = jax.block_until_ready(patch_embed_forward(x, weight, bias, patch_size))

    # Pure-JAX f32 reference (strided conv via dot on extracted patches).
    Ho, Wo = H // patch_size[0], W // patch_size[1]
    ref_patches = x.reshape(B, C, Ho, patch_size[0], Wo, patch_size[1])
    ref_patches = ref_patches.transpose(0, 2, 4, 1, 3, 5).reshape(B * Ho * Wo, -1)
    ref = (ref_patches @ weight.reshape(embed_dim, -1).T + bias
           ).reshape(B, Ho * Wo, embed_dim)

    assert y.shape == (B, Ho * Wo, embed_dim)
    # bf16 inputs / f32 MXU accumulation: compare at a bf16-appropriate tolerance.
    assert jnp.allclose(y, ref, atol=2e-2, rtol=2e-2), float(jnp.max(jnp.abs(y - ref)))

    print("KERNEL_OK")
</pallas_src>

<mosaic_0001>
module attributes {stable_mosaic.version = 11 : i64} {
  func.func @_patch_proj_kernel(%arg0: i32, %arg1: memref<16x64xbf16, #tpu.memory_space<vmem>>, %arg2: memref<64x32xbf16, #tpu.memory_space<vmem>>, %arg3: memref<1x32xf32, #tpu.memory_space<vmem>>, %arg4: memref<16x32xf32, #tpu.memory_space<vmem>>) attributes {dimension_semantics = [#tpu.dimension_semantics<parallel>], iteration_bounds = array<i64: 2>, scalar_prefetch = 0 : i64, scratch_operands = 0 : i64, tpu.core_type = #tpu.core_type<tc>, window_params = [{transform_indices = @transform_0, window_bounds = array<i64: 16, 64>}, {pipeline_mode = #tpu.pipeline_mode<synchronous>, transform_indices = @transform_1, window_bounds = array<i64: 64, 32>}, {pipeline_mode = #tpu.pipeline_mode<synchronous>, transform_indices = @transform_2, window_bounds = array<i64: 1, 32>}, {transform_indices = @transform_3, window_bounds = array<i64: 16, 32>}]} {
    %c0 = arith.constant 0 : index
    %c0_0 = arith.constant 0 : index
    %0 = vector.load %arg1[%c0, %c0_0] : memref<16x64xbf16, #tpu.memory_space<vmem>>, vector<16x64xbf16>
    %c0_1 = arith.constant 0 : index
    %c0_2 = arith.constant 0 : index
    %1 = vector.load %arg2[%c0_1, %c0_2] : memref<64x32xbf16, #tpu.memory_space<vmem>>, vector<64x32xbf16>
    %cst = arith.constant dense<0.000000e+00> : vector<16x32xf32>
    %2 = tpu.matmul %0, %1, %cst {dimension_numbers = #tpu.dot_dimension_numbers<[1], [0], [0], [1], [0, 0, 1, 1], [], []>} : vector<16x64xbf16>, vector<64x32xbf16>, vector<16x32xf32> -> vector<16x32xf32>
    %c0_3 = arith.constant 0 : index
    %c0_4 = arith.constant 0 : index
    %3 = vector.load %arg3[%c0_3, %c0_4] : memref<1x32xf32, #tpu.memory_space<vmem>>, vector<1x32xf32>
    %4 = vector.broadcast %3 : vector<1x32xf32> to vector<16x32xf32>
    %5 = arith.addf %2, %4 : vector<16x32xf32>
    %c0_5 = arith.constant 0 : index
    %c0_6 = arith.constant 0 : index
    %6 = vector.load %arg4[%c0_5, %c0_6] : memref<16x32xf32, #tpu.memory_space<vmem>>, vector<16x32xf32>
    tpu.vector_store %arg4[%c0_5, %c0_6], %5 {strides = array<i32>} : memref<16x32xf32, #tpu.memory_space<vmem>>, vector<16x32xf32>,
    return
  }
  func.func @transform_0(%arg0: i32) -> (i32, i32) {
    %c0_i32 = arith.constant 0 : i32
    %c0_i32_0 = arith.constant 0 : i32
    return %arg0, %c0_i32 : i32, i32
  }
  func.func @transform_1(%arg0: i32) -> (i32, i32) {
    %c0_i32 = arith.constant 0 : i32
    %c0_i32_0 = arith.constant 0 : i32
    %c0_i32_1 = arith.constant 0 : i32
    return %c0_i32, %c0_i32_0 : i32, i32
  }
  func.func @transform_2(%arg0: i32) -> (i32, i32) {
    %c0_i32 = arith.constant 0 : i32
    %c0_i32_0 = arith.constant 0 : i32
    %c0_i32_1 = arith.constant 0 : i32
    return %c0_i32, %c0_i32_0 : i32, i32
  }
  func.func @transform_3(%arg0: i32) -> (i32, i32) {
    %c0_i32 = arith.constant 0 : i32
    %c0_i32_0 = arith.constant 0 : i32
    return %arg0, %c0_i32 : i32, i32
  }
}

</mosaic_0001>

<bundles_post_ra>
// kernel: tpu_custom_call.1
= control target key start
LH: loop header
LB: loop body
LE: loop exit
PB: predicated region body
PF: predicated region fallthrough
CT: control target
= control target key end

     0   :  { %8 = vsyncpa [#allocation3], 0  ;;  %s581_s0 = inlined_call_operand.vmem [shape: bf16[32,64], index: 0, kind: input, shape index: {}]   ;;  %s582_s1 = inlined_call_operand.vmem [shape: bf16[64,32], index: 1, kind: input, shape index: {}]   ;;  %s583_s2 = inlined_call_operand.vmem [shape: f32[1,32], index: 2, kind: input, shape index: {}]   ;;  %s584_s3 = inlined_call_operand.hbm [shape: f32[32,32], index: 3, kind: output, shape index: {}]  }
   0x1   :  { %10 = vsyncpa [#allocation3 + $0x1], 0  ;;  %s482_s12 = smov 0   ;;  %s484_s13 = smov 0  }
   0x2   :  { %s486_s14 = smov 0   ;;  %s488_s15 = smov 0  }
   0x3 LB: > { %s503_s16 = sadd.s32 4294967295, %s458_s15   ;;  %s315_s17 = sadd.s32 4294967294, %s458_s15   ;;  %s458_s15 = sphi %s488_s15, %s590_s15   ;;  %s454_s14 = sphi %s486_s14, %s589_s14   ;;  %s450_s13 = sphi %s484_s13, %s588_s13   ;;  %s446_s12 = sphi %s482_s12, %s587_s12  }
   0x4   : > { %s507_s18 = sadd.s32 1, %s458_s15   ;;  %s91_s19 = sadd.s32 1, %s454_s14 }
   0x5   : > { %s88_s20 = ssub.s32 %s458_s15, %s507_s18  ;;  %p101_p0 = scmp.ne.s32.totalorder %s454_s14, %s450_s13 }
   0x6   : > { %p89_p1 = scmp.eq.s32.totalorder %s88_s20, 0  ;;  %p102_p2 = scmp.eq.s32.totalorder %s503_s16, 1 }
   0x7   : > { %p107_p3 = scmp.ne.s32.totalorder %s450_s13, %s446_s12  ;;  %p108_p4 = scmp.eq.s32.totalorder %s315_s17, 1 }
   0x8   : > { %s518_s21 = scalar_select %p89_p1, %s454_s14, %s91_s19  }
   0x9   : > { %p520_p5 = por %p102_p2, %p101_p0  ;;  %p524_p6 = por %p108_p4, %p107_p3 }
   0xa   : > { %p318_p7 = scmp.ge.s32.totalorder %s458_s15, 1  ;;  %p141_p8 = scmp.lt.s32.totalorder %s458_s15, 3 }
   0xc   : > { %p142_p9 = pnand %p318_p7, %p141_p8 }
   0xd   : > { %s320_s26 = sshll.u32 (!%p142_p9), %s503_s16, 1  ;;  %s162_s10 = sand.u32 (!%p142_p9), 1, %s450_s13  }
   0xe   : > { %145 = sbr.rel (%p142_p9) target bundleno = 175 (0xaf), region = 32  ;;  %p166_p10 = scmp.lt.s32.totalorder (!%p142_p9), %s320_s26, 3 }
   0xf   : > { %s319_s11 = sshll.u32 (!%p142_p9), %s162_s10, 4  ;;  %s353_s20 = sshll.u32 (!%p142_p9), %s503_s16, 4 }
  0x10   : > { %s164_s27 = scalar_lea.vmem (!%p142_p9), [#allocation2], %s319_s11  ;;  %s238_s30 = scalar_lea.sflag (!%p142_p9), [#allocation3], %s162_s10 }
  0x11   : > { %s250_s28 = sshll.u32 (!%p142_p9), %s164_s27, 4  ;;  %s416_s7 = scalar_lea.hbm (!%p142_p9), %s584_s3, 32  ;;  %s251_s28 = int_to_ptr.vmem [resolvable:$true] %s250_s28 }
  0x13   : > { %v352_v0 = vld [vmem:[%s582_s1 + $0x18] sm:$0xff]  ;;  %v351_v1 = vld [vmem:[%s582_s1 + $0x10] sm:$0xff]  ;;  %s592_s26 = smov (!%p166_p10, %s320_s26), 3  ;;  %v350_v2 = vld [vmem:[%s582_s1 + $0x8] sm:$0xff]  ;;  %vm216_vm0 = vcmask 523264   ;;  %vm234_vm1 = vcmask 261120  }
  0x14   : > { %224 = vmatpush.bf16.msra.mxu0 %v352_v0  ;;  %s321_s4 = sshll.u32 %s592_s26, 2  ;;  %v349_v3 = vld [vmem:[%s582_s1] sm:$0xff]  ;;  %s249_s26 = scalar_lea.hbm %s584_s3, %s353_s20 }
  0x15   : > { %s169_s9 = scalar_lea.vmem %s581_s0, %s321_s4  ;;  %v395_v5 = vld [vmem:[%s583_s2] ss:$0 sm:$0xff]  ;;  %s252_s29 = sshll.u32 %s249_s26, 4  ;;  %s253_s29 = int_to_ptr.hbm [resolvable:$true] %s252_s29 }
  0x16   : > { %v348_v4 = vld [vmem:[%s169_s9] sm:$0xff]  ;;  %s410_s4 = sshra.s32 %s253_s29, 4  ;;  %s411_s4 = int_to_ptr.hbm [resolvable:$true] %s410_s4 }
  0x17   : > { %s412_s16 = scalar_lea.hbm %s411_s4, 16  ;;  %p417_p0 = scmp.lt.s32.totalorder %s411_s4, %s584_s3 }
  0x18   : > { %225 = vmatpush.bf16.msra.mxu0 %v351_v1  ;;  %p413_p11 = scmp.ne.s32.totalorder %s411_s4, %s412_s16  ;;  %p418_p1 = scmp.lt.s32.totalorder %s416_s7, %s412_s16 }
  0x1a   : > { %p414_p12 = pnand %p413_p11, %p520_p5  ;;  %p419_p2 = por %p418_p1, %p417_p0 }
  0x1c   : > { %226 = vmatpush.bf16.msra.mxu0 %v350_v2  ;;  %p415_p13 = pneg %p414_p12 }
  0x1e   : > { %p420_p3 = pnand %p419_p2, %p415_p13 }
  0x20   : > { %227 = vmatpush.bf16.msra.mxu0 %v349_v3 }
  0x23   : > { %342 = vmatmul.msk.bf16.vlgmr.msra.gmra.mxu0 %vm216_vm0, %v348_v4 }
  0xa0   : > { %v229_v6 = vpop.f32.mrf.mxu0 }
  0xa1   : > { %v230_v7 = vadd.f32 %v395_v5, %v229_v6 }
  0xa3   : > { %235 = vst.msk [vmem:[%s164_s27] sm:$0xff] %vm234_vm1, %v230_v7 }
  0xa8   : > { %v231_v8 = vpop.f32.mrf.mxu0 }
  0xa9   : > { %v232_v9 = vadd.f32 %v395_v5, %v231_v8 }
  0xab   : > { %236 = vst.msk [vmem:[%s164_s27 + $0x8] sm:$0xff] %vm234_vm1, %v232_v9 }
  0xac   : > { %423 = shalt.err (!%p420_p3)
}
  0xad   : > { %s460_s10 = smov 128   ;;  %s461_s11 = smov 8  }
  0xae   : > { %354 = dma.vmem_to_hbm [thread:$0]  (%p520_p5), %s251_s28, 256, %s253_s29, %s238_s30, %s460_s10, %s460_s10, %s461_s11  }
  0xaf PF: > { %p360_p4 = scmp.ge.s32.totalorder %s458_s15, 2  ;;  %s267_s17 = sand.u32 1, %s446_s12  }
  0xb0   : > { %s268_s19 = scalar_lea.sflag [#allocation3], %s267_s17 }
  0xb1   : > { %p357_p7 = pnand %p360_p4, %p524_p6 }
  0xb3   : > { %p358_p8 = pneg %p357_p7 }
  0xb5   : > { %441 = dma.done.wait (%p358_p8), %s268_s19, 256  }
  0xb6   : > { %443 = vsyncadd (%p358_p8), %s268_s19, 4294967040  ;;  %p13_p9 = scmp.ge.s32.totalorder %s507_s18, 4   ;;  %s587_s12 = smov %s450_s13 }
  0xb7   : > { %s588_s13 = smov %s454_s14  ;;  %s589_s14 = smov %s518_s21 }
  0xb8   : > { %s590_s15 = smov %s507_s18  ;;  %15 = sbr.rel (!%p13_p9) target bundleno = 3 (0x3), region = 67 }
  0xbd   :  { %274 = vsyncpa [#allocation3], 1 }
  0xbe   :  { %276 = vsyncpa [#allocation3 + $0x1], 1 }

</bundles_post_ra>
